<compile_context>
chip_gen: v7x
topology: tpu7x:2x2x1
jax: 0.10.0
libtpu: 0.0.40
codegen_flags: <defaults>
</compile_context>

<pallas_src>
import jax
import jax.numpy as jnp
from jax.experimental import pallas as pl
from jax.experimental.pallas import tpu as pltpu


N_EMO, N_SENT, N_DIM = 5, 3, 3
N_HEADS = N_EMO + N_SENT + N_DIM  # 11


def _round_up(x, m):
    return (x + m - 1) // m * m


def _packed_dims(feat_dim, hidden_dim):
    # K1: rows for [x | 1] in the encoder block, 8-sublane aligned.
    k1 = _round_up(feat_dim + 1, 8)
    # Hp: lane-dense hidden width with a spare "ones lane" reserved at Hp-1.
    hp = _round_up(hidden_dim + 1, 128)
    return k1, hp


def _multiview_kernel(x_ref, w_ref, out_ref):
    # x_ref   : (Bp, K1)          bf16, rows = [x_cls | 1.0 | 0-pad]
    # w_ref   : (K1 + 2*Hp, Hp)   bf16 slab: [enc+b | proj+b+ones-passthrough | heads+b]
    # out_ref : (Bp, Hp)          f32, first 11 lanes are the fused head logits
    k1 = x_ref.shape[1]
    hp = w_ref.shape[1]
    ones_lane = hp - 1

    x = x_ref[...]                            # (Bp, K1) bf16
    w1 = w_ref[0:k1, :]                       # (K1, Hp)  enc weights, row F = b_enc
    w2 = w_ref[k1:k1 + hp, :]                 # (Hp, Hp)  proj weights, bias + ones passthrough
    w3 = w_ref[k1 + hp:k1 + 2 * hp, :]        # (Hp, Hp)  fused heads, bias row

    # synthetic encoder on the CLS row: tanh(x @ W_enc + b_enc), f32 accumulation
    h = jnp.tanh(jnp.dot(x, w1, preferred_element_type=jnp.float32))   # (Bp, Hp) f32

    # restore the bias-carrier lane (tanh(0) zeroed it) -- one VPU select
    lane = jax.lax.broadcasted_iota(jnp.int32, h.shape, dimension=1)
    h = jnp.where(lane == ones_lane, 1.0, h)

    # projection + ReLU; proj bias folded via the ones lane, which also passes
    # through W2's identity column so it stays exactly 1.0 after ReLU.
    p = jnp.maximum(
        jnp.dot(h.astype(w2.dtype), w2, preferred_element_type=jnp.float32), 0.0)

    # fused emotion / sentiment / dimension heads: one matmul, one lane-dense store
    out_ref[...] = jnp.dot(
        p.astype(w3.dtype), w3, preferred_element_type=jnp.float32
    ).astype(out_ref.dtype)


def multiview_forward(x, w_slab):
    """x: (B, T, F) float32 -> (emotion (B,5), sentiment (B,3), dimension (B,3))."""
    B, _, F = x.shape
    hp = w_slab.shape[1]
    k1 = w_slab.shape[0] - 2 * hp
    bp = max(_round_up(B, 8), 8)

    # Only the CLS timestep feeds the outputs with the synthetic per-timestep
    # encoder -> slice before the pallas_call boundary (T x less input DMA).
    x_cls = x[:, 0, :]                                        # (B, F)
    x_aug = jnp.zeros((bp, k1), jnp.bfloat16)
    x_aug = x_aug.at[:B, :F].set(x_cls.astype(jnp.bfloat16))  # features
    x_aug = x_aug.at[:B, F].set(1.0)                          # ones column (enc bias)

    vmem = pl.BlockSpec(memory_space=pltpu.MemorySpace.VMEM)
    cost = pl.CostEstimate(
        flops=2 * bp * (k1 * hp + hp * hp + hp * hp),
        transcendentals=bp * hp,  # tanh
        bytes_accessed=2 * (x_aug.size + w_slab.size) + 4 * bp * hp,
    )

    out = pl.pallas_call(
        _multiview_kernel,
        out_shape=jax.ShapeDtypeStruct((bp, hp), jnp.float32),
        in_specs=[vmem, vmem],
        out_specs=vmem,
        cost_estimate=cost,
    )(x_aug, w_slab)

    out = out[:B]
    emotion = out[:, :N_EMO]
    sentiment = out[:, N_EMO:N_EMO + N_SENT]
    dimension = out[:, N_EMO + N_SENT:N_HEADS]
    return emotion, sentiment, dimension


def init_params(key, feat_dim, hidden_dim):
    """Deterministic parameter init (PyTorch Linear convention: W is (out, in))."""
    ks = jax.random.split(key, 10)
    scale = 0.05

    def lin(kw, kb, out_dim, in_dim):
        w = scale * jax.random.normal(kw, (out_dim, in_dim), jnp.float32)
        b = scale * jax.random.normal(kb, (1, out_dim), jnp.float32)
        return w, b

    w_enc, b_enc = lin(ks[0], ks[1], hidden_dim, feat_dim)
    w_proj, b_proj = lin(ks[2], ks[3], hidden_dim, hidden_dim)
    w_emo, b_emo = lin(ks[4], ks[5], N_EMO, hidden_dim)
    w_sent, b_sent = lin(ks[6], ks[7], N_SENT, hidden_dim)
    w_dim, b_dim = lin(ks[8], ks[9], N_DIM, hidden_dim)
    return (w_enc, b_enc, w_proj, b_proj,
            w_emo, b_emo, w_sent, b_sent, w_dim, b_dim)


def pack_params(params):
    """Pre-transpose, fold biases, pad to 8-row / 128-lane alignment, cast bf16."""
    (w_enc, b_enc, w_proj, b_proj,
     w_emo, b_emo, w_sent, b_sent, w_dim, b_dim) = params
    H, F = w_enc.shape
    k1, hp = _packed_dims(F, H)
    ones_lane = hp - 1
    assert H <= ones_lane, "hidden_dim must leave room for the ones lane"

    # encoder block: rows 0..F-1 = W_enc.T, row F = b_enc, rest zero
    w1 = jnp.zeros((k1, hp), jnp.float32)
    w1 = w1.at[:F, :H].set(w_enc.T)
    w1 = w1.at[F, :H].set(b_enc[0])

    # projection block: bias on the ones-lane row; identity passthrough keeps the
    # ones lane exactly 1.0 through the ReLU.
    w2 = jnp.zeros((hp, hp), jnp.float32)
    w2 = w2.at[:H, :H].set(w_proj.T)
    w2 = w2.at[ones_lane, :H].set(b_proj[0])
    w2 = w2.at[ones_lane, ones_lane].set(1.0)

    # fused heads block: 11 output lanes, bias on the ones-lane row, rest zero
    w_head = jnp.concatenate([w_emo, w_sent, w_dim], axis=0)     # (11, H)
    b_head = jnp.concatenate([b_emo, b_sent, b_dim], axis=-1)    # (1, 11)
    w3 = jnp.zeros((hp, hp), jnp.float32)
    w3 = w3.at[:H, :N_HEADS].set(w_head.T)
    w3 = w3.at[ones_lane, :N_HEADS].set(b_head[0])

    return jnp.concatenate([w1, w2, w3], axis=0).astype(jnp.bfloat16)  # (K1+2Hp, Hp)


if __name__ == "__main__":
    B, T, F, H = 2, 8, 16, 32

    key = jax.random.PRNGKey(0)
    k_x, k_p = jax.random.split(key)
    x = jax.random.normal(k_x, (B, T, F), jnp.float32)
    params = init_params(k_p, F, H)
    w_slab = pack_params(params)

    emotion, sentiment, dimension = jax.block_until_ready(
        multiview_forward(x, w_slab))

    (w_enc, b_enc, w_proj, b_proj,
     w_emo, b_emo, w_sent, b_sent, w_dim, b_dim) = params
    x_cls = x[:, 0, :]

    # (1) bf16-matched reference (same rounding as the kernel) -- tight check.
    def _bf(a):
        return a.astype(jnp.bfloat16).astype(jnp.float32)

    h_m = jnp.tanh(_bf(x_cls) @ _bf(w_enc).T + _bf(b_enc))
    p_m = jnp.maximum(_bf(h_m) @ _bf(w_proj).T + _bf(b_proj), 0.0)
    pb = _bf(p_m)
    emo_m = pb @ _bf(w_emo).T + _bf(b_emo)
    sent_m = pb @ _bf(w_sent).T + _bf(b_sent)
    dim_m = pb @ _bf(w_dim).T + _bf(b_dim)

    # (2) full-f32 PyTorch-semantics reference -- loose check (bf16 weights).
    h_r = jnp.tanh(x_cls @ w_enc.T + b_enc)
    p_r = jnp.maximum(h_r @ w_proj.T + b_proj, 0.0)
    emo_r = p_r @ w_emo.T + b_emo
    sent_r = p_r @ w_sent.T + b_sent
    dim_r = p_r @ w_dim.T + b_dim

    assert emotion.shape == (B, N_EMO)
    assert sentiment.shape == (B, N_SENT)
    assert dimension.shape == (B, N_DIM)

    assert jnp.allclose(emotion, emo_m, atol=1e-3)
    assert jnp.allclose(sentiment, sent_m, atol=1e-3)
    assert jnp.allclose(dimension, dim_m, atol=1e-3)

    assert jnp.allclose(emotion, emo_r, atol=3e-2)
    assert jnp.allclose(sentiment, sent_r, atol=3e-2)
    assert jnp.allclose(dimension, dim_r, atol=3e-2)

    print("KERNEL_OK")
</pallas_src>

<mosaic_0001>
module attributes {stable_mosaic.version = 11 : i64} {
  func.func @_multiview_kernel(%arg0: memref<8x24xbf16, #tpu.memory_space<vmem>>, %arg1: memref<280x128xbf16, #tpu.memory_space<vmem>>, %arg2: memref<8x128xf32, #tpu.memory_space<vmem>>) attributes {dimension_semantics = [], scalar_prefetch = 0 : i64, scratch_operands = 0 : i64, tpu.core_type = #tpu.core_type<tc>} {
    %c0 = arith.constant 0 : index
    %c0_0 = arith.constant 0 : index
    %0 = vector.load %arg0[%c0, %c0_0] : memref<8x24xbf16, #tpu.memory_space<vmem>>, vector<8x24xbf16>
    %c0_1 = arith.constant 0 : index
    %c0_2 = arith.constant 0 : index
    %1 = vector.load %arg1[%c0_1, %c0_2] : memref<280x128xbf16, #tpu.memory_space<vmem>>, vector<24x128xbf16>
    %c24 = arith.constant 24 : index
    %c0_3 = arith.constant 0 : index
    %2 = vector.load %arg1[%c24, %c0_3] : memref<280x128xbf16, #tpu.memory_space<vmem>>, vector<128x128xbf16>
    %c152 = arith.constant 152 : index
    %c0_4 = arith.constant 0 : index
    %3 = vector.load %arg1[%c152, %c0_4] : memref<280x128xbf16, #tpu.memory_space<vmem>>, vector<128x128xbf16>
    %cst = arith.constant dense<0.000000e+00> : vector<8x128xf32>
    %4 = tpu.matmul %0, %1, %cst {dimension_numbers = #tpu.dot_dimension_numbers<[1], [0], [0], [1], [0, 0, 1, 1], [], []>} : vector<8x24xbf16>, vector<24x128xbf16>, vector<8x128xf32> -> vector<8x128xf32>
    %5 = math.tanh %4 : vector<8x128xf32>
    %6 = tpu.iota {dimensions = array<i32: 1>} : vector<8x128xi32>
    %c127_i32 = arith.constant 127 : i32
    %7 = vector.broadcast %c127_i32 : i32 to vector<8x128xi32>
    %8 = arith.cmpi eq, %6, %7 : vector<8x128xi32>
    %cst_5 = arith.constant 1.000000e+00 : f32
    %9 = vector.broadcast %cst_5 : f32 to vector<8x128xf32>
    %10 = arith.select %8, %9, %5 : vector<8x128xi1>, vector<8x128xf32>
    %11 = arith.truncf %10 : vector<8x128xf32> to vector<8x128xbf16>
    %cst_6 = arith.constant dense<0.000000e+00> : vector<8x128xf32>
    %12 = tpu.matmul %11, %2, %cst_6 {dimension_numbers = #tpu.dot_dimension_numbers<[1], [0], [0], [1], [0, 0, 1, 1], [], []>} : vector<8x128xbf16>, vector<128x128xbf16>, vector<8x128xf32> -> vector<8x128xf32>
    %cst_7 = arith.constant 0.000000e+00 : f32
    %13 = vector.broadcast %cst_7 : f32 to vector<8x128xf32>
    %14 = arith.maximumf %12, %13 : vector<8x128xf32>
    %15 = arith.truncf %14 : vector<8x128xf32> to vector<8x128xbf16>
    %cst_8 = arith.constant dense<0.000000e+00> : vector<8x128xf32>
    %16 = tpu.matmul %15, %3, %cst_8 {dimension_numbers = #tpu.dot_dimension_numbers<[1], [0], [0], [1], [0, 0, 1, 1], [], []>} : vector<8x128xbf16>, vector<128x128xbf16>, vector<8x128xf32> -> vector<8x128xf32>
    %c0_9 = arith.constant 0 : index
    %c0_10 = arith.constant 0 : index
    %17 = vector.load %arg2[%c0_9, %c0_10] : memref<8x128xf32, #tpu.memory_space<vmem>>, vector<8x128xf32>
    tpu.vector_store %arg2[%c0_9, %c0_10], %16 {strides = array<i32>} : memref<8x128xf32, #tpu.memory_space<vmem>>, vector<8x128xf32>,
    return
  }
}

</mosaic_0001>

<bundles_post_ra>
// kernel: tpu_custom_call.1
= control target key start
LH: loop header
LB: loop body
LE: loop exit
PB: predicated region body
PF: predicated region fallthrough
CT: control target
= control target key end

     0   :  { %7 = vsyncpa [#allocation3], 0  ;;  %s588_s0 = inlined_call_operand.hbm [shape: bf16[8,24], index: 0, kind: input, shape index: {}]   ;;  %s589_s1 = inlined_call_operand.hbm [shape: bf16[280,128], index: 1, kind: input, shape index: {}]   ;;  %s590_s2 = inlined_call_operand.hbm [shape: f32[8,128], index: 2, kind: output, shape index: {}]  }
   0x1   :  { %8 = vsyncpa [#allocation6], 0 }
   0x2   :  { %9 = vsyncpa [#allocation4], 0  ;;  %s520_s9 = smov [#allocation2]   ;;  %s521_s11 = smov [#allocation5]  }
   0x3   :  { %s16_s10 = sshll.u32 %s520_s9, 4  ;;  %s25_s12 = sshll.u32 %s521_s11, 4  ;;  %s17_s10 = int_to_ptr.vmem [resolvable:$true] %s16_s10  ;;  %s542_s12 = int_to_ptr.vmem [resolvable:$true] %s25_s12 }
   0x4   :  { %s448_s15 = scalar_lea.hbm %s588_s0, 64 }
   0x5   :  { %p449_p0 = scmp.ne.s32.totalorder %s588_s0, %s448_s15  ;;  %p452_p1 = scmp.lt.u32.totalorder %s448_s15, %s588_s0 }
   0x7   :  { %p454_p2 = pnand %p452_p1, %p449_p0 }
   0x9   :  { %457 = shalt.err (!%p454_p2)
}
   0xa   :  { %s458_s20 = scalar_lea.vmem %s17_s10, 64  ;;  %p463_p4 = scmp.lt.s32.totalorder %s17_s10, %s17_s10 }
   0xb   :  { %p459_p3 = scmp.ne.s32.totalorder %s17_s10, %s458_s20  ;;  %p464_p5 = scmp.lt.s32.totalorder %s458_s20, %s458_s20 }
   0xd   :  { %p465_p6 = por %p464_p5, %p463_p4 }
   0xf   :  { %p466_p7 = pnand %p465_p6, %p459_p3 }
  0x11   :  { %469 = shalt.err (!%p466_p7)
}
  0x12   :  { %19 = dma.hbm_to_vmem [thread:$0]  %s588_s0, 64, %s17_s10, [#allocation3]  }
  0x13   :  { %s470_s25 = scalar_lea.hbm %s589_s1, 2240 }
  0x14   :  { %p471_p8 = scmp.ne.s32.totalorder %s589_s1, %s470_s25  ;;  %p474_p9 = scmp.lt.u32.totalorder %s470_s25, %s589_s1 }
  0x16   :  { %p476_p10 = pnand %p474_p9, %p471_p8 }
  0x18   :  { %479 = shalt.err (!%p476_p10)
}
  0x19   :  { %s480_s30 = scalar_lea.vmem %s542_s12, 2240  ;;  %p485_p12 = scmp.lt.s32.totalorder %s542_s12, %s542_s12 }
  0x1a   :  { %p481_p11 = scmp.ne.s32.totalorder %s542_s12, %s480_s30  ;;  %p486_p13 = scmp.lt.s32.totalorder %s480_s30, %s480_s30 }
  0x1c   :  { %p487_p0 = por %p486_p13, %p485_p12 }
  0x1e   :  { %p488_p1 = pnand %p487_p0, %p481_p11 }
  0x20   :  { %491 = shalt.err (!%p488_p1)
}
  0x21   :  { %s522_s0 = smov 64   ;;  %s523_s3 = smov 4  }
  0x22   :  { %31 = dma.hbm_to_vmem [thread:$0]  %s589_s1, 2240, %s542_s12, [#allocation6], %s522_s0, %s522_s0, %s523_s3  }
  0x23   :  { %514 = dma.done.wait [#allocation3], 64  }
  0x24   :  { %515 = vsyncadd [#allocation3], 4294967232 }
  0x25   :  { %516 = dma.done.wait [#allocation6], 2240  }
  0x26   :  { %517 = vsyncadd [#allocation6], 4294965056  ;;  %v524_v0 = vmov 0.0   ;;  %vm525_vm0 = vmmov 0   ;;  %v428_v1 = vld [vmem:[#allocation5] sm:$0xff]   ;;  %vm88_vm1 = vcmask 1043456   ;;  %v133_v22 = vlaneseq }
  0x27   :  { %373 = vmatprep.subr.bf16.mxu0 %v524_v0  ;;  %377 = vmatprep.mubr.msk.bf16.mxu0 %vm525_vm0, %v524_v0  ;;  %v429_v2 = vld [vmem:[#allocation5 + $0x8] ss:$0 sps:$4 sm:$0xff]   ;;  %v430_v3 = vld [vmem:[#allocation5 + $0xc] sm:$0xff]   ;;  %vm84_vm2 = vcmask 195584   ;;  %v431_v5 = vld [vmem:[#allocation5 + $0x14] sm:$0xff]   ;;  %s526_s1 = smov [#allocation7]  }
  0x28   :  { %381 = vmatprep.subr.bf16.mxu1 %v524_v0  ;;  %397 = vmatprep.mubr.msk.bf16.mxu1 %vm525_vm0, %v524_v0  ;;  %v90_v4 = vsel %vm88_vm1, %v429_v2, 0  ;;  %v39_v6 = vld [vmem:[#allocation2] sm:$0xf]  ;;  %v433_v8 = vld [vmem:[#allocation5 + $0x24] sm:$0xff]   ;;  %v434_v9 = vld [vmem:[#allocation5 + $0x2c] sm:$0xff]   ;;  %v134_v25 = vand.u32 127, %v133_v22 }
  0x29   :  { %374 = vmatpush3.bf16.msra.mxu0 %v428_v1  ;;  %382 = vmatpush3.bf16.msra.mxu1 %v430_v3  ;;  %v432_v7 = vld [vmem:[#allocation5 + $0x1c] sm:$0xff]   ;;  %v435_v10 = vld [vmem:[#allocation5 + $0x34] sm:$0xff]   ;;  %v437_v12 = vld [vmem:[#allocation5 + $0x44] sm:$0xff]   ;;  %s323_s6 = sshll.u32 %s526_s1, 4  ;;  %s324_s6 = int_to_ptr.vmem [resolvable:$true] %s323_s6 }
  0x2a   :  { %375 = vmatprep.subr.bf16.mxu0 %v524_v0  ;;  %383 = vmatprep.subr.bf16.mxu1 %v524_v0  ;;  %v436_v11 = vld [vmem:[#allocation5 + $0x3c] sm:$0xff]   ;;  %v438_v13 = vld [vmem:[#allocation5 + $0x4c] sm:$0xff]   ;;  %v439_v14 = vld [vmem:[#allocation5 + $0x54] sm:$0xff]   ;;  %vm135_vm3 = vcmp.eq.s32.totalorder %v134_v25, 127  ;;  %s492_s7 = scalar_lea.vmem %s324_s6, 128  ;;  %p497_p3 = scmp.lt.s32.totalorder %s324_s6, %s324_s6 }
  0x2b   :  { %v440_v15 = vld [vmem:[#allocation5 + $0x5c] sm:$0xff]   ;;  %v441_v16 = vld [vmem:[#allocation5 + $0x64] sm:$0xff]   ;;  %v442_v17 = vld [vmem:[#allocation5 + $0x6c] sm:$0xff]   ;;  %p493_p2 = scmp.ne.s32.totalorder %s324_s6, %s492_s7  ;;  %p498_p4 = scmp.lt.s32.totalorder %s492_s7, %s492_s7 }
  0x2c   :  { %v443_v18 = vld [vmem:[#allocation5 + $0x74] sm:$0xff]   ;;  %v444_v19 = vld [vmem:[#allocation5 + $0x7c] sm:$0xff]   ;;  %v445_v29 = vld [vmem:[#allocation5 + $0x84] sm:$0xff]  }
  0x2d   :  { %376 = vmatpush3.bf16.msra.mxu0 %v90_v4  ;;  %384 = vmatpush3.bf16.msra.mxu1 %v431_v5  ;;  %p499_p5 = por %p498_p4, %p497_p3 }
  0x2e   :  { %401 = vmatprep.subr.bf16.mxu0 %v524_v0  ;;  %385 = vmatprep.subr.bf16.mxu1 %v524_v0 }
  0x2f   :  { %p500_p6 = pnand %p499_p5, %p493_p2 }
  0x30   :  { %378 = vmatmul.mubr.msk.bf16.vlgmr.msra.gmra.mrb[0].mxu0 %vm84_vm2, %v39_v6 }
  0x31   :  { %417 = vmatprep.mubr.msk.bf16.mxu0 %vm525_vm0, %v524_v0  ;;  %386 = vmatpush3.bf16.msra.mxu1 %v432_v7 }
  0x32   :  { %387 = vmatprep.subr.bf16.mxu1 %v524_v0  ;;  %402 = vmatpush3.bf16.msra.mxu0 %v438_v13 }
  0x33   :  { %403 = vmatprep.subr.bf16.mxu0 %v524_v0 }
  0x35   :  { %388 = vmatpush3.bf16.msra.mxu1 %v433_v8 }
  0x36   :  { %389 = vmatprep.subr.bf16.mxu1 %v524_v0  ;;  %404 = vmatpush3.bf16.msra.mxu0 %v439_v14 }
  0x37   :  { %405 = vmatprep.subr.bf16.mxu0 %v524_v0 }
  0x39   :  { %390 = vmatpush3.bf16.msra.mxu1 %v434_v9 }
  0x3a   :  { %391 = vmatprep.subr.bf16.mxu1 %v524_v0  ;;  %406 = vmatpush3.bf16.msra.mxu0 %v440_v15 }
  0x3b   :  { %407 = vmatprep.subr.bf16.mxu0 %v524_v0 }
  0x3d   :  { %392 = vmatpush3.bf16.msra.mxu1 %v435_v10 }
  0x3e   :  { %393 = vmatprep.subr.bf16.mxu1 %v524_v0  ;;  %408 = vmatpush3.bf16.msra.mxu0 %v441_v16 }
  0x3f   :  { %409 = vmatprep.subr.bf16.mxu0 %v524_v0 }
  0x41   :  { %394 = vmatpush3.bf16.msra.mxu1 %v436_v11 }
  0x42   :  { %395 = vmatprep.subr.bf16.mxu1 %v524_v0  ;;  %410 = vmatpush3.bf16.msra.mxu0 %v442_v17 }
  0x43   :  { %411 = vmatprep.subr.bf16.mxu0 %v524_v0 }
  0x45   :  { %396 = vmatpush3.bf16.msra.mxu1 %v437_v12 }
  0x46   :  { %412 = vmatpush3.bf16.msra.mxu0 %v443_v18 }
  0x47   :  { %413 = vmatprep.subr.bf16.mxu0 %v524_v0 }
  0x4a   :  { %414 = vmatpush3.bf16.msra.mxu0 %v444_v19 }
  0x4b   :  { %415 = vmatprep.subr.bf16.mxu0 %v524_v0 }
  0x4e   :  { %416 = vmatpush3.bf16.msra.mxu0 %v445_v29 }
 0x103   :  { %v126_v20 = vpop.f32.mrb[0].mxu0 }
 0x104   :  { %446 = vtanh.f32 %v126_v20  ;;  %v379_v21 = vpop.f32.mrb[1].mxu0 }
 0x105   :  { %v129_v23 = vpop.f32.mrb[2].mxu0 }
 0x106   :  { %v380_v24 = vpop.f32.mrb[3].mxu0 }
 0x10e   :  { %v447_v26 = vpop.eup %446 }
 0x10f   :  { %v136_v27 = vsel %vm135_vm3, 1.0, %v447_v26 }
 0x110   :  { %v137_v28 = vpack.c.bf16 %v136_v27, %v136_v27 }
 0x112   :  { %398 = vmatmul.mubr.bf16.vlgmr.msra.gmra.mrb[0].mxu1 %v137_v28 }
 0x1e5   :  { %v220_v30 = vpop.f32.mrb[0].mxu1 }
 0x1e6   :  { %v226_v31 = vmax.f32 %v220_v30, 0.0  ;;  %v399_v32 = vpop.f32.mrb[1].mxu1 }
 0x1e7   :  { %v223_v33 = vpop.f32.mrb[2].mxu1 }
 0x1e8   :  { %v227_v34 = vpack.c.bf16 %v226_v31, %v226_v31  ;;  %v400_v35 = vpop.f32.mrb[3].mxu1 }
 0x1ea   :  { %418 = vmatmul.mubr.bf16.vlgmr.msra.gmra.mrb[4].mxu0 %v227_v34 }
 0x2bd   :  { %v310_v36 = vpop.f32.mrb[4].mxu0 }
 0x2be   :  { %316 = vst [vmem:[#allocation7] sm:$0xff] %v310_v36  ;;  %v419_v37 = vpop.f32.mrb[5].mxu0 }
 0x2bf   :  { %v313_v38 = vpop.f32.mrb[6].mxu0 }
 0x2c0   :  { %503 = shalt.err (!%p500_p6)
}
 0x2c1   :  { %s504_s10 = scalar_lea.hbm %s590_s2, 128 }
 0x2c2   :  { %p505_p7 = scmp.ne.s32.totalorder %s590_s2, %s504_s10  ;;  %p508_p8 = scmp.lt.u32.totalorder %s504_s10, %s590_s2 }
 0x2c4   :  { %p510_p9 = pnand %p508_p8, %p505_p7 }
 0x2c6   :  { %513 = shalt.err (!%p510_p9)
}
 0x2c7   :  { %326 = dma.vmem_to_hbm [thread:$0]  %s324_s6, 128, %s590_s2, [#allocation4]   ;;  %v420_v39 = vpop.f32.mrb[7].mxu0 }
 0x2c8   :  { %518 = dma.done.wait [#allocation4], 128  }
 0x2c9   :  { %519 = vsyncadd [#allocation4], 4294967168 }
 0x2ca   :  { %330 = vsyncpa [#allocation3], 1 }
 0x2cb   :  { %331 = vsyncpa [#allocation6], 1 }
 0x2cc   :  { %332 = vsyncpa [#allocation4], 1 }

</bundles_post_ra>
